<compile_context>
chip_gen: v7x
topology: tpu7x:2x2x1
jax: 0.10.0
libtpu: 0.0.40
codegen_flags: <defaults>
</compile_context>

<pallas_src>
import functools

import jax
import jax.numpy as jnp
from jax.experimental import pallas as pl
from jax.experimental.pallas import tpu as pltpu


# ---------------------------------------------------------------------------
# Parameter construction (mirrors GDN.__init__ + handle(), done in plain JAX)
# ---------------------------------------------------------------------------
def make_gdn_params(in_channels: int,
                    beta_min: float = 1e-6,
                    gamma_init: float = 0.1):
    reparam_offset = 2.0 ** (-18)
    pedestal = reparam_offset ** 2

    # beta = NonNegativeParametrizer(minimum=beta_min).init(ones(C))
    beta_raw = jnp.sqrt(jnp.maximum(jnp.ones((in_channels,), jnp.float32) + pedestal,
                                    pedestal))
    # gamma = NonNegativeParametrizer().init(gamma_init * eye(C))
    gamma_raw = jnp.sqrt(jnp.maximum(gamma_init * jnp.eye(in_channels, dtype=jnp.float32)
                                     + pedestal, pedestal))

    # handle(): apply the reparametrizers' forward()
    # (LowerBound's custom gradient is training-only; forward == max)
    beta_bound = (beta_min + pedestal) ** 0.5
    gamma_bound = (0.0 + pedestal) ** 0.5
    beta2 = jnp.maximum(beta_raw, beta_bound) ** 2 - pedestal          # (C,)
    gamma2 = jnp.maximum(gamma_raw, gamma_bound) ** 2 - pedestal       # (C, C)
    return beta2, gamma2


def _round_up(x: int, m: int) -> int:
    return ((x + m - 1) // m) * m


def _round_down(x: int, m: int) -> int:
    return (x // m) * m


def _vmem_capacity_bytes() -> int:
    try:
        cap = getattr(pltpu.get_tpu_info(), "vmem_capacity_bytes", None)
        if cap:
            return int(cap)
    except Exception:
        pass
    return 128 << 20  # conservative v5e/v6e default


# ---------------------------------------------------------------------------
# Pallas kernel: per pixel-tile  norm = gamma @ x^2 + beta ; out = x * rsqrt(norm)
# Block shapes: x/o (1, C, tile_p)  gamma (C, C)  beta (C, 1)
# ---------------------------------------------------------------------------
def _gdn_kernel(x_ref, g_ref, b_ref, o_ref, *, inverse: bool, unroll_c: bool):
    x = x_ref[0].astype(jnp.float32)                     # (C, tile_p), pixels on lanes
    x2 = x * x

    if unroll_c:
        # Tiny-C path: unrolled VPU FMA (avoids a tall-skinny MXU matmul).
        c = g_ref.shape[0]
        norm = b_ref[...].astype(jnp.float32) + \
            g_ref[:, 0:1].astype(jnp.float32) * x2[0:1, :]
        for j in range(1, c):
            norm = norm + g_ref[:, j:j + 1].astype(jnp.float32) * x2[j:j + 1, :]
    else:
        # norm[i, p] = sum_j gamma[i, j] * x2[j, p]  (== 1x1 conv over channels)
        norm = jnp.dot(g_ref[...], x2.astype(g_ref.dtype),
                       preferred_element_type=jnp.float32)   # (C, tile_p)
        norm = norm + b_ref[...]                              # (C, 1) lane broadcast

    if inverse:
        norm = jnp.sqrt(norm)
    else:
        norm = jax.lax.rsqrt(norm)
    o_ref[0] = (x * norm).astype(o_ref.dtype)


def gdn_forward(x_nchw, beta2, gamma2, *, inverse: bool = False, tile_p: int = 8192):
    """x_nchw: (N, C, H, W). Returns (N, C, H, W)."""
    N, C, H, W = x_nchw.shape
    HW = H * W
    itemsize = jnp.dtype(x_nchw.dtype).itemsize

    # ---- parameters (resident in VMEM) --------------------------------------
    gamma_dtype = jnp.bfloat16 if C >= 512 else jnp.float32   # bf16 MXU only when it matters
    gamma = gamma2.astype(gamma_dtype)                        # (C, C)
    beta_col = beta2.reshape(C, 1).astype(jnp.float32)        # (C, 1)
    unroll_c = C < 8
    param_bytes = C * C * jnp.dtype(gamma_dtype).itemsize + C * 4

    # ---- tile sizing: lane axis = pixels, multiple of 128 -------------------
    tile_p = max(128, _round_up(tile_p, 128))
    tile_p = min(tile_p, _round_up(HW, 128))      # never bigger than (padded) HW

    # VMEM budget: exactly 2 in-tiles + 2 out-tiles (double buffered) + params.
    vmem_cap = _vmem_capacity_bytes()             # 64 MiB v7x, 128 MiB v5e/v6e
    vmem_budget_cap = int(0.75 * vmem_cap)
    headroom = 2 << 20
    max_tile_bytes = max(128 * C * itemsize,
                         (vmem_budget_cap - 2 * param_bytes - headroom) // 4)
    max_tile_p = max(128, _round_down(max_tile_bytes // (C * itemsize), 128))
    tile_p = min(tile_p, max_tile_p)

    # Keep enough grid steps to feed both v7x TensorCores / amortize pipelining.
    min_steps = 8
    while N * pl.cdiv(HW, tile_p) < min_steps and tile_p > 512:
        tile_p = max(512, _round_down(tile_p // 2, 128))

    num_p_tiles = pl.cdiv(HW, tile_p)             # ragged last block handled by Pallas
    vmem_limit = 4 * C * tile_p * itemsize + 2 * param_bytes + headroom
    vmem_limit = int(max(16 << 20, min(vmem_limit, vmem_budget_cap)))

    # ---- flatten spatial dims (no transpose, no pad, no slice) --------------
    x = x_nchw.reshape(N, C, HW)

    cost = pl.CostEstimate(
        flops=2 * N * C * C * HW + 4 * N * C * HW,
        bytes_accessed=2 * N * C * HW * itemsize + param_bytes,
        transcendentals=N * C * HW,
    )

    kernel = functools.partial(_gdn_kernel, inverse=inverse, unroll_c=unroll_c)

    out = pl.pallas_call(
        kernel,
        out_shape=jax.ShapeDtypeStruct((N, C, HW), x.dtype),
        grid_spec=pl.GridSpec(
            grid=(N, num_p_tiles),
            in_specs=[
                pl.BlockSpec((1, C, tile_p), lambda n, p: (n, 0, p)),  # x tile
                pl.BlockSpec((C, C), lambda n, p: (0, 0)),             # gamma (resident)
                pl.BlockSpec((C, 1), lambda n, p: (0, 0)),             # beta  (resident)
            ],
            out_specs=pl.BlockSpec((1, C, tile_p), lambda n, p: (n, 0, p)),
        ),
        compiler_params=pltpu.CompilerParams(
            dimension_semantics=("parallel", "parallel"),
            vmem_limit_bytes=vmem_limit,
        ),
        cost_estimate=cost,
    )(x, gamma, beta_col)

    return out.reshape(N, C, H, W)


# ---------------------------------------------------------------------------
# Pure-JAX reference for validation
# ---------------------------------------------------------------------------
def gdn_reference(x_nchw, beta2, gamma2, *, inverse: bool = False):
    x2 = x_nchw ** 2                                     # (N, C, H, W)
    # 1x1 conv: norm[n,i,h,w] = beta[i] + sum_j gamma[i,j] * x2[n,j,h,w]
    norm = jnp.einsum('ij,njhw->nihw', gamma2, x2) + beta2[None, :, None, None]
    norm = jnp.sqrt(norm) if inverse else jax.lax.rsqrt(norm)
    return x_nchw * norm


if __name__ == "__main__":
    N, C, H, W = 2, 4, 16, 16
    key = jax.random.PRNGKey(0)
    x = jax.random.normal(key, (N, C, H, W), dtype=jnp.float32)

    beta2, gamma2 = make_gdn_params(C)

    # forward GDN
    out = jax.block_until_ready(gdn_forward(x, beta2, gamma2, inverse=False))
    ref = gdn_reference(x, beta2, gamma2, inverse=False)
    assert out.shape == x.shape and out.dtype == x.dtype
    assert jnp.allclose(out, ref, atol=1e-5, rtol=1e-5), "GDN mismatch vs reference"

    # inverse GDN (same kernel, sqrt branch)
    out_i = jax.block_until_ready(gdn_forward(x, beta2, gamma2, inverse=True))
    ref_i = gdn_reference(x, beta2, gamma2, inverse=True)
    assert jnp.allclose(out_i, ref_i, atol=1e-5, rtol=1e-5), "IGDN mismatch vs reference"

    print("KERNEL_OK")
</pallas_src>

<mosaic_0001>
module attributes {stable_mosaic.version = 11 : i64} {
  func.func @_gdn_kernel(%arg0: i32, %arg1: i32, %arg2: memref<1x4x256xf32, #tpu.memory_space<vmem>>, %arg3: memref<4x4xf32, #tpu.memory_space<vmem>>, %arg4: memref<4x1xf32, #tpu.memory_space<vmem>>, %arg5: memref<1x4x256xf32, #tpu.memory_space<vmem>>) attributes {dimension_semantics = [#tpu.dimension_semantics<parallel>, #tpu.dimension_semantics<parallel>], iteration_bounds = array<i64: 2, 1>, scalar_prefetch = 0 : i64, scratch_operands = 0 : i64, tpu.core_type = #tpu.core_type<tc>, window_params = [{transform_indices = @transform_0, window_bounds = array<i64: 1, 4, 256>}, {pipeline_mode = #tpu.pipeline_mode<synchronous>, transform_indices = @transform_1, window_bounds = array<i64: 4, 4>}, {pipeline_mode = #tpu.pipeline_mode<synchronous>, transform_indices = @transform_2, window_bounds = array<i64: 4, 1>}, {transform_indices = @transform_3, window_bounds = array<i64: 1, 4, 256>}]} {
    %c0 = arith.constant 0 : index
    %c0_0 = arith.constant 0 : index
    %c0_1 = arith.constant 0 : index
    %0 = vector.load %arg2[%c0, %c0_0, %c0_1] : memref<1x4x256xf32, #tpu.memory_space<vmem>>, vector<1x4x256xf32>
    %1 = vector.shape_cast %0 : vector<1x4x256xf32> to vector<4x256xf32>
    %2 = arith.mulf %1, %1 : vector<4x256xf32>
    %c0_2 = arith.constant 0 : index
    %c0_3 = arith.constant 0 : index
    %3 = vector.load %arg4[%c0_2, %c0_3] : memref<4x1xf32, #tpu.memory_space<vmem>>, vector<4x1xf32>
    %c0_4 = arith.constant 0 : index
    %c0_5 = arith.constant 0 : index
    %4 = vector.load %arg3[%c0_4, %c0_5] : memref<4x4xf32, #tpu.memory_space<vmem>>, vector<4x1xf32>
    %5 = vector.extract_strided_slice %2 {offsets = [0, 0], sizes = [1, 256], strides = [1, 1]} : vector<4x256xf32> to vector<1x256xf32>
    %6 = vector.broadcast %4 : vector<4x1xf32> to vector<4x256xf32>
    %7 = vector.broadcast %5 : vector<1x256xf32> to vector<4x256xf32>
    %8 = arith.mulf %6, %7 : vector<4x256xf32>
    %9 = vector.broadcast %3 : vector<4x1xf32> to vector<4x256xf32>
    %10 = arith.addf %9, %8 : vector<4x256xf32>
    %c0_6 = arith.constant 0 : index
    %c1 = arith.constant 1 : index
    %11 = vector.load %arg3[%c0_6, %c1] : memref<4x4xf32, #tpu.memory_space<vmem>>, vector<4x1xf32>
    %12 = vector.extract_strided_slice %2 {offsets = [1, 0], sizes = [1, 256], strides = [1, 1]} : vector<4x256xf32> to vector<1x256xf32>
    %13 = vector.broadcast %11 : vector<4x1xf32> to vector<4x256xf32>
    %14 = vector.broadcast %12 : vector<1x256xf32> to vector<4x256xf32>
    %15 = arith.mulf %13, %14 : vector<4x256xf32>
    %16 = arith.addf %10, %15 : vector<4x256xf32>
    %c0_7 = arith.constant 0 : index
    %c2 = arith.constant 2 : index
    %17 = vector.load %arg3[%c0_7, %c2] : memref<4x4xf32, #tpu.memory_space<vmem>>, vector<4x1xf32>
    %18 = vector.extract_strided_slice %2 {offsets = [2, 0], sizes = [1, 256], strides = [1, 1]} : vector<4x256xf32> to vector<1x256xf32>
    %19 = vector.broadcast %17 : vector<4x1xf32> to vector<4x256xf32>
    %20 = vector.broadcast %18 : vector<1x256xf32> to vector<4x256xf32>
    %21 = arith.mulf %19, %20 : vector<4x256xf32>
    %22 = arith.addf %16, %21 : vector<4x256xf32>
    %c0_8 = arith.constant 0 : index
    %c3 = arith.constant 3 : index
    %23 = vector.load %arg3[%c0_8, %c3] : memref<4x4xf32, #tpu.memory_space<vmem>>, vector<4x1xf32>
    %24 = vector.extract_strided_slice %2 {offsets = [3, 0], sizes = [1, 256], strides = [1, 1]} : vector<4x256xf32> to vector<1x256xf32>
    %25 = vector.broadcast %23 : vector<4x1xf32> to vector<4x256xf32>
    %26 = vector.broadcast %24 : vector<1x256xf32> to vector<4x256xf32>
    %27 = arith.mulf %25, %26 : vector<4x256xf32>
    %28 = arith.addf %22, %27 : vector<4x256xf32>
    %29 = math.rsqrt %28 : vector<4x256xf32>
    %30 = arith.mulf %1, %29 : vector<4x256xf32>
    %c0_9 = arith.constant 0 : index
    %c0_10 = arith.constant 0 : index
    %c0_11 = arith.constant 0 : index
    %31 = vector.load %arg5[%c0_9, %c0_10, %c0_11] : memref<1x4x256xf32, #tpu.memory_space<vmem>>, vector<1x4x256xf32>
    %32 = vector.shape_cast %31 : vector<1x4x256xf32> to vector<4x256xf32>
    %33 = vector.shape_cast %30 : vector<4x256xf32> to vector<1x4x256xf32>
    tpu.vector_store %arg5[%c0_9, %c0_10, %c0_11], %33 {strides = array<i32>} : memref<1x4x256xf32, #tpu.memory_space<vmem>>, vector<1x4x256xf32>,
    return
  }
  func.func @transform_0(%arg0: i32, %arg1: i32) -> (i32, i32, i32) {
    %c0_i32 = arith.constant 0 : i32
    %c0_i32_0 = arith.constant 0 : i32
    return %arg0, %c0_i32, %arg1 : i32, i32, i32
  }
  func.func @transform_1(%arg0: i32, %arg1: i32) -> (i32, i32) {
    %c0_i32 = arith.constant 0 : i32
    %c0_i32_0 = arith.constant 0 : i32
    %c0_i32_1 = arith.constant 0 : i32
    return %c0_i32, %c0_i32_0 : i32, i32
  }
  func.func @transform_2(%arg0: i32, %arg1: i32) -> (i32, i32) {
    %c0_i32 = arith.constant 0 : i32
    %c0_i32_0 = arith.constant 0 : i32
    %c0_i32_1 = arith.constant 0 : i32
    return %c0_i32, %c0_i32_0 : i32, i32
  }
  func.func @transform_3(%arg0: i32, %arg1: i32) -> (i32, i32, i32) {
    %c0_i32 = arith.constant 0 : i32
    %c0_i32_0 = arith.constant 0 : i32
    return %arg0, %c0_i32, %arg1 : i32, i32, i32
  }
}

</mosaic_0001>

<bundles_post_ra>
// kernel: tpu_custom_call.1
= control target key start
LH: loop header
LB: loop body
LE: loop exit
PB: predicated region body
PF: predicated region fallthrough
CT: control target
= control target key end

     0   :  { %8 = vsyncpa [#allocation3], 0  ;;  %s844_s0 = inlined_call_operand.hbm [shape: f32[2,4,256], index: 0, kind: input, shape index: {}]   ;;  %s845_s1 = inlined_call_operand.vmem [shape: f32[4,4], index: 1, kind: input, shape index: {}]   ;;  %s846_s2 = inlined_call_operand.vmem [shape: f32[4,1], index: 2, kind: input, shape index: {}]   ;;  %s847_s3 = inlined_call_operand.hbm [shape: f32[2,4,256], index: 3, kind: output, shape index: {}]  }
   0x1   :  { %10 = vsyncpa [#allocation3 + $0x1], 0 }
   0x2   :  { %11 = vsyncpa [#allocation4], 0 }
   0x3   :  { %13 = vsyncpa [#allocation4 + $0x1], 0  ;;  %s662_s12 = smov 0   ;;  %s664_s13 = smov 0  }
   0x4   :  { %s666_s14 = smov 0   ;;  %s668_s15 = smov 0  }
   0x5   :  { %s670_s16 = smov 0   ;;  %s672_s17 = smov 0  }
   0x6 LB: > { %s431_s18 = sadd.s32 4294967295, %s634_s17   ;;  %s432_s19 = sadd.s32 4294967294, %s634_s17   ;;  %s634_s17 = sphi %s672_s17, %s19_s17   ;;  %s630_s16 = sphi %s670_s16, %s863_s16   ;;  %s626_s15 = sphi %s668_s15, %s862_s15   ;;  %s622_s14 = sphi %s666_s14, %s861_s14   ;;  %s618_s13 = sphi %s664_s13, %s860_s13   ;;  %s614_s12 = sphi %s662_s12, %s859_s12  }
   0x7   : > { %s31_s20 = sadd.s32 1, %s630_s16  ;;  %s40_s21 = sadd.s32 1, %s622_s14 }
   0x8   : > { %p33_p0 = scmp.ge.s32.totalorder %s31_s20, 2  ;;  %p47_p1 = scmp.ne.s32.totalorder %s622_s14, %s618_s13 }
   0x9   : > { %p48_p2 = scmp.eq.s32.totalorder %s634_s17, 0  ;;  %p53_p3 = scmp.ne.s32.totalorder %s618_s13, %s614_s12 }
   0xa   : > { %s865_s20 = smov (%p33_p0, %s31_s20), 0  ;;  %p54_p5 = scmp.eq.s32.totalorder %s431_s18, 0 }
   0xb   : > { %p703_p4 = por %p48_p2, %p47_p1  ;;  %s35_s23 = ssub.s32 %s630_s16, %s865_s20 }
   0xc   : > { %p121_p6 = scmp.eq.s32.totalorder %s431_s18, 1  ;;  %p38_p7 = scmp.eq.s32.totalorder %s35_s23, 0 }
   0xd   : > { %p709_p8 = por %p54_p5, %p53_p3  ;;  %p127_p10 = scmp.eq.s32.totalorder %s432_s19, 1 }
   0xe   : > { %p713_p9 = por %p121_p6, %p47_p1  ;;  %p460_p13 = scmp.lt.s32.totalorder %s634_s17, 2 }
   0xf   : > { %s718_s26 = scalar_select %p38_p7, %s622_s14, %s40_s21  }
  0x10   : > { %s851_s25 = scalar_select %p713_p9, 1, 0 }
  0x11   : > { %p720_p11 = por %p127_p10, %p53_p3  ;;  %s153_s28 = sand.u32 1, %s622_s14  }
  0x12   : > { %s435_s29 = sshll.u32 %s153_s28, 3  ;;  %s446_s30 = sshll.u32 %s630_s16, 7 }
  0x13   : > { %s852_s27 = scalar_select %p720_p11, 1, 0 }
  0x14   : > { %s731_s6 = scalar_lea.hbm %s844_s0, %s446_s30  ;;  %s157_s7 = scalar_lea.vmem [#allocation2], %s435_s29 }
  0x15   : > { %s167_s8 = sshll.u32 %s157_s7, 4  ;;  %p737_p0 = pnand %p460_p13, %p703_p4  ;;  %s733_s8 = int_to_ptr.vmem [resolvable:$true] %s167_s8 }
  0x16   : > { %s154_s10 = scalar_lea.sflag [#allocation3], %s153_s28  ;;  %s522_s11 = scalar_lea.hbm %s731_s6, 128 }
  0x17   : > { %p523_p3 = scmp.ne.s32.totalorder %s731_s6, %s522_s11  ;;  %p524_p5 = pneg %p737_p0 }
  0x18   : > { %s527_s21 = scalar_lea.hbm %s844_s0, 256  ;;  %p528_p4 = scmp.lt.u32.totalorder %s731_s6, %s844_s0 }
  0x19   : > { %p525_p6 = pnand %p524_p5, %p523_p3  ;;  %p529_p10 = scmp.lt.u32.totalorder %s527_s21, %s522_s11 }
  0x1a   : > { %p531_p12 = scmp.lt.u32.totalorder %s522_s11, %s731_s6 }
  0x1b   : > { %p526_p7 = pneg %p525_p6  ;;  %p530_p13 = por %p529_p10, %p528_p4 }
  0x1d   : > { %p532_p1 = por %p531_p12, %p530_p13 }
  0x1f   : > { %p533_p2 = pnand %p532_p1, %p526_p7 }
  0x21   : > { %536 = shalt.err (!%p533_p2)
}
  0x22   : > { %s537_s28 = scalar_lea.vmem %s733_s8, 128  ;;  %s636_s29 = smov [#allocation2]  }
  0x23   : > { %p538_p3 = scmp.ne.s32.totalorder %s733_s8, %s537_s28  ;;  %s542_s30 = sshll.u32 %s636_s29, 4  ;;  %s543_s30 = int_to_ptr.vmem [resolvable:$false] %s542_s30 }
  0x24   : > { %s544_s4 = scalar_lea.vmem %s543_s30, 256  ;;  %p545_p9 = scmp.lt.s32.totalorder %s733_s8, %s543_s30 }
  0x25   : > { %p540_p6 = pnand %p538_p3, %p524_p5  ;;  %p546_p4 = scmp.lt.s32.totalorder %s544_s4, %s537_s28 }
  0x27   : > { %p541_p11 = pneg %p540_p6  ;;  %p547_p10 = por %p546_p4, %p545_p9 }
  0x29   : > { %p548_p12 = pnand %p547_p10, %p541_p11 }
  0x2b   : > { %551 = shalt.err (!%p548_p12)
}
  0x2c   : > { %455 = dma.hbm_to_vmem [thread:$0]  (!%p737_p0), %s731_s6, 128, %s733_s8, %s154_s10  }
  0x2d   : > { %p854_p1 = scmp.lt.s32.totalorder %s634_s17, 3  ;;  %p855_p2 = scmp.ge.s32.totalorder %s634_s17, 1 }
  0x2f   : > { %p173_p5 = pnand %p855_p2, %p854_p1 }
  0x30   : > { %s773_s5 = sand.u32 (!%p173_p5), 1, %s618_s13  }
  0x31   : > { %176 = sbr.rel (%p173_p5) target bundleno = 230 (0xe6), region = 32  ;;  %s439_s7 = sshll.u32 (!%p173_p5), %s773_s5, 3 }
  0x32   : > { %s179_s11 = scalar_lea.sflag (!%p173_p5), [#allocation3], %s773_s5  ;;  %s182_s9 = scalar_lea.vmem (!%p173_p5), [#allocation2], %s439_s7 }
  0x38   : > { %605 = dma.done.wait (%p709_p8), %s179_s11, 128  }
  0x39   : > { %607 = vsyncadd (%p709_p8), %s179_s11, 4294967168  ;;  %v637_v0 = vmov 0   ;;  %v638_v1 = vmov 1   ;;  %v210_v2 = vld [vmem:[%s845_s1] sm:$0xf]  ;;  %v639_v4 = vmov 2   ;;  %v217_v6 = vlaneseq }
  0x3a   : > { %514 = vset.pattern.permute.xlu0 %v637_v0  ;;  %515 = vset.pattern.permute.xlu1 %v638_v1  ;;  %v209_v3 = vld [vmem:[%s846_s2] sm:$0xf]  ;;  %v640_v5 = vmov 3   ;;  %s447_s24 = sshll.u32 %s626_s15, 7  ;;  %s204_s19 = scalar_lea.vmem [#allocation5], %s439_s7 }
  0x3b   : > { %213 = vperm.xlu0 %514, %v210_v2   ;;  %245 = vperm.xlu1 %515, %v210_v2   ;;  %v218_v7 = vshrl.u32 %v217_v6, 7  ;;  %v207_v8 = vld [vmem:[%s182_s9] sm:$0xff]  ;;  %s347_s21 = sshll.u32 %s204_s19, 4  ;;  %s795_s28 = scalar_lea.hbm %s847_s3, %s447_s24  ;;  %s797_s21 = int_to_ptr.vmem [resolvable:$true] %s347_s21 }
  0x3c   : > { %v208_v11 = vmul.f32 %v207_v8, %v207_v8  ;;  %s331_s29 = scalar_lea.sflag [#allocation4], %s773_s5  ;;  %s552_s30 = scalar_lea.vmem %s797_s21, 128 }
  0x3d   : > { %v219_v9 = vsub.s32 0, %v218_v7  ;;  %v223_v10 = vsub.s32 4, %v218_v7  ;;  %v250_v12 = vsub.s32 1, %v218_v7  ;;  %v254_v13 = vsub.s32 5, %v218_v7  ;;  %p553_p8 = scmp.ne.s32.totalorder %s797_s21, %s552_s30  ;;  %p856_p9 = scmp.ne.s32.totalorder %s851_s25, 0 }
  0x3e   : > { %v276_v14 = vsub.s32 2, %v218_v7  ;;  %v280_v15 = vsub.s32 6, %v218_v7  ;;  %v302_v22 = vsub.s32 3, %v218_v7  ;;  %v306_v23 = vsub.s32 7, %v218_v7  ;;  %s641_s15 = smov [#allocation5]  }
  0x3f   : > { %239 = vperm.xlu0 %514, %v209_v3   ;;  %516 = vset.pattern.permute.xlu1 %v639_v4  ;;  %v220_v16 = vrot.slane %v208_v11, %v219_v9  ;;  %v224_v17 = vrot.slane %v208_v11, %v223_v10  ;;  %v251_v18 = vrot.slane %v208_v11, %v250_v12  ;;  %p554_p11 = pnand %p553_p8, %p856_p9  ;;  %s556_s4 = sshll.u32 %s641_s15, 4  ;;  %s557_s4 = int_to_ptr.vmem [resolvable:$false] %s556_s4 }
  0x40   : > { %271 = vperm.xlu1 %516, %v210_v2   ;;  %v255_v19 = vrot.slane %v208_v11, %v254_v13  ;;  %v277_v20 = vrot.slane %v208_v11, %v276_v14  ;;  %v281_v21 = vrot.slane %v208_v11, %v280_v15  ;;  %v303_v32 = vrot.slane %v208_v11, %v302_v22  ;;  %s558_s7 = scalar_lea.vmem %s557_s4, 256  ;;  %p559_p7 = scmp.lt.s32.totalorder %s797_s21, %s557_s4 }
  0x41   : > { %v230_v24 = vrot.slane %v220_v16, %v219_v9  ;;  %v234_v25 = vrot.slane %v224_v17, %v219_v9  ;;  %v261_v28 = vrot.slane %v251_v18, %v250_v12  ;;  %v307_v33 = vrot.slane %v208_v11, %v306_v23  ;;  %p555_p0 = pneg %p554_p11  ;;  %p560_p13 = scmp.lt.s32.totalorder %s558_s7, %s552_s30 }
  0x42   : > { %v265_v29 = vrot.slane %v255_v19, %v250_v12  ;;  %v287_v30 = vrot.slane %v277_v20, %v276_v14  ;;  %v291_v31 = vrot.slane %v281_v21, %v276_v14  ;;  %v313_v44 = vrot.slane %v303_v32, %v302_v22 }
  0x43   : > { %517 = vset.pattern.permute.xlu0 %v640_v5  ;;  %v317_v45 = vrot.slane %v307_v33, %v302_v22  ;;  %p561_p3 = por %p560_p13, %p559_p7 }
  0x44   : > { %297 = vperm.xlu0 %517, %v210_v2  }
  0x45   : > { %p562_p6 = pnand %p561_p3, %p555_p0 }
  0xba   : > { %v214_v26 = vpop.permute.xlu0 %213  ;;  %v246_v27 = vpop.permute.xlu1 %245 }
  0xbb   : > { %v235_v34 = vmul.f32 %v230_v24, %v214_v26  ;;  %v236_v35 = vmul.f32 %v234_v25, %v214_v26  ;;  %v266_v37 = vmul.f32 %v261_v28, %v246_v27  ;;  %v267_v38 = vmul.f32 %v265_v29, %v246_v27 }
  0xbe   : > { %v240_v36 = vpop.permute.xlu0 %239 }
  0xbf   : > { %v242_v39 = vadd.f32 %v240_v36, %v235_v34  ;;  %v243_v40 = vadd.f32 %v240_v36, %v236_v35  ;;  %v272_v41 = vpop.permute.xlu1 %271 }
  0xc0   : > { %v292_v42 = vmul.f32 %v287_v30, %v272_v41  ;;  %v293_v43 = vmul.f32 %v291_v31, %v272_v41 }
  0xc1   : > { %v268_v46 = vadd.f32 %v266_v37, %v242_v39  ;;  %v269_v47 = vadd.f32 %v267_v38, %v243_v40 }
  0xc3   : > { %v294_v48 = vadd.f32 %v292_v42, %v268_v46  ;;  %v295_v49 = vadd.f32 %v293_v43, %v269_v47  ;;  %v298_v50 = vpop.permute.xlu0 %297 }
  0xc4   : > { %v318_v51 = vmul.f32 %v313_v44, %v298_v50  ;;  %v319_v52 = vmul.f32 %v317_v45, %v298_v50 }
  0xc6   : > { %v320_v53 = vadd.f32 %v318_v51, %v294_v48  ;;  %v321_v54 = vadd.f32 %v319_v52, %v295_v49 }
  0xc8   : > { %518 = vrsqrt.f32 %v320_v53 }
  0xc9   : > { %520 = vrsqrt.f32 %v321_v54 }
  0xd2   : > { %v519_v55 = vpop.eup %518 }
  0xd3   : > { %v521_v56 = vpop.eup %520 }
  0xd4   : > { %v326_v57 = vcombine.low %v519_v55, %v521_v56 }
  0xd6   : > { %v328_v58 = vmul.f32 %v326_v57, %v207_v8 }
  0xd8   : > { %329 = vst [vmem:[%s204_s19] sm:$0xff] %v328_v58 }
  0xd9   : > { %565 = shalt.err (!%p562_p6)
}
  0xda   : > { %s566_s5 = scalar_lea.hbm %s795_s28, 128  ;;  %s570_s6 = scalar_lea.hbm %s847_s3, 256 }
  0xdb   : > { %p567_p4 = scmp.ne.s32.totalorder %s795_s28, %s566_s5  ;;  %p571_p1 = scmp.lt.u32.totalorder %s795_s28, %s847_s3 }
  0xdc   : > { %p572_p2 = scmp.lt.u32.totalorder %s570_s6, %s566_s5  ;;  %p574_p8 = scmp.lt.u32.totalorder %s566_s5, %s795_s28 }
  0xdd   : > { %p568_p10 = pnand %p567_p4, %p856_p9 }
  0xde   : > { %p573_p5 = por %p572_p2, %p571_p1 }
  0xdf   : > { %p569_p12 = pneg %p568_p10 }
  0xe0   : > { %p575_p11 = por %p574_p8, %p573_p5 }
  0xe2   : > { %p576_p0 = pnand %p575_p11, %p569_p12 }
  0xe4   : > { %579 = shalt.err (!%p576_p0)
}
  0xe5   : > { %450 = dma.vmem_to_hbm [thread:$0]  (%p856_p9), %s797_s21, 128, %s795_s28, %s331_s29  }
  0xe6 PF: > { %s359_s18 = sand.u32 1, %s614_s12   ;;  %p857_p7 = scmp.ne.s32.totalorder %s852_s27, 0 }
  0xe7   : > { %p858_p13 = scmp.ge.s32.totalorder %s634_s17, 2  ;;  %s360_s24 = scalar_lea.sflag [#allocation4], %s359_s18 }
  0xe9   : > { %p457_p3 = pnand %p858_p13, %p857_p7 }
  0xeb   : > { %609 = dma.done.wait (!%p457_p3), %s360_s24, 128  }
  0xec   : > { %611 = vsyncadd (!%p457_p3), %s360_s24, 4294967168  ;;  %s19_s17 = sadd.s32 1, %s634_s17   ;;  %s859_s12 = smov %s618_s13 }
  0xed   : > { %p16_p6 = scmp.ge.s32.totalorder %s19_s17, 4   ;;  %s860_s13 = smov %s622_s14 }
  0xee   : > { %s861_s14 = smov %s718_s26  ;;  %s862_s15 = smov %s630_s16 }
  0xef   : > { %s863_s16 = smov %s865_s20  ;;  %18 = sbr.rel (!%p16_p6) target bundleno = 6 (0x6), region = 77 }
  0xf6   :  { %365 = vsyncpa [#allocation3], 1 }
  0xf7   :  { %367 = vsyncpa [#allocation3 + $0x1], 1 }
  0xf8   :  { %368 = vsyncpa [#allocation4], 1 }
  0xf9   :  { %370 = vsyncpa [#allocation4 + $0x1], 1 }

</bundles_post_ra>
